<compile_context>
chip_gen: v7x
topology: tpu7x:2x2x1
jax: 0.10.0
libtpu: 0.0.40
codegen_flags: <defaults>
</compile_context>

<pallas_src>
import jax
import jax.numpy as jnp
from jax.experimental import pallas as pl
from jax.experimental.pallas import tpu as pltpu


def _round_up(n, m):
    return ((n + m - 1) // m) * m


def _mlp_kernel(xt_ref, w1_ref, b1_ref, w23_ref, b23_ref, o_ref):
    # xt_ref : (D, TB)  f32   -- one batch tile, batch on lanes
    # w1_ref : (384, D) bf16  -- pinned across the grid
    # b1_ref : (384, 1) f32
    # w23_ref: (384, 1) f32   -- fused shared2 @ output weights (transposed)
    # b23_ref: (1, 1)   f32
    # o_ref  : (1, TB)  f32   -- lane-dense output block
    xt = xt_ref[...]
    xt = xt * jax.nn.sigmoid(xt)                                # SiLU on the input (f32)

    # shared1 on the MXU: bf16 operands, f32 accumulation.
    h = jnp.dot(w1_ref[...], xt.astype(jnp.bfloat16),
                preferred_element_type=jnp.float32)             # (384, TB)
    h = h + b1_ref[...]
    h = h * jax.nn.sigmoid(h)                                   # SiLU (dropout = identity, eval)

    # Fused shared2 -> output projection: broadcast-mul (VPU) + sublane reduce.
    out = jnp.sum(h * w23_ref[...], axis=0, keepdims=True) + b23_ref[...]   # (1, TB)
    o_ref[...] = out.astype(o_ref.dtype)


def binary_mlp_forward(x, params, *, tile_b=512):
    """x: (B, D) f32; params: ((W1,b1),(W2,b2),(W3,b3)) in PyTorch (out,in)/(out,) layout."""
    (w1, b1), (w2, b2), (w3, b3) = params
    B, D = x.shape
    H1 = w1.shape[0]                                            # 384

    # --- host-side param prep (exact for eval-mode dropout) -------------------
    w23 = (w3 @ w2).T.astype(jnp.float32)                       # (384, 1)
    b23 = (w3 @ b2 + b3).reshape(1, 1).astype(jnp.float32)      # (1, 1)
    w1_bf = w1.astype(jnp.bfloat16)                             # (384, D)
    b1_col = b1.reshape(-1, 1).astype(jnp.float32)              # (384, 1)

    # --- batch tiling: lane-dense tiles, multiple of 128, padded --------------
    tb = min(tile_b, _round_up(B, 128))
    bp = _round_up(B, tb)
    x_t = jnp.pad(x, ((0, bp - B), (0, 0))).T                   # (D, Bp), batch on lanes

    out_t = pl.pallas_call(
        _mlp_kernel,
        out_shape=jax.ShapeDtypeStruct((1, bp), jnp.float32),
        grid=(bp // tb,),
        in_specs=[
            pl.BlockSpec((D, tb), lambda i: (0, i)),            # x tile marches over batch
            pl.BlockSpec((H1, D), lambda i: (0, 0)),            # W1 pinned in VMEM
            pl.BlockSpec((H1, 1), lambda i: (0, 0)),            # b1 pinned
            pl.BlockSpec((H1, 1), lambda i: (0, 0)),            # W23 pinned
            pl.BlockSpec((1, 1), lambda i: (0, 0)),             # b23 pinned
        ],
        out_specs=pl.BlockSpec((1, tb), lambda i: (0, i)),      # lane-dense output blocks
        compiler_params=pltpu.CompilerParams(
            dimension_semantics=("parallel",),                  # megacore sharding on v7x
            vmem_limit_bytes=32 << 20,                          # safe on v7x (64 MiB physical)
        ),
    )(x_t, w1_bf, b1_col, w23, b23)

    return out_t[0, :B].reshape(B, 1)


def init_params(key, input_dim):
    """PyTorch nn.Linear-style init: U(-1/sqrt(fan_in), 1/sqrt(fan_in)), (out,in) weights."""
    dims = [(input_dim, 384), (384, 192), (192, 1)]
    params = []
    for fan_in, fan_out in dims:
        key, kw, kb = jax.random.split(key, 3)
        bound = float(fan_in) ** -0.5
        w = jax.random.uniform(kw, (fan_out, fan_in), jnp.float32, -bound, bound)
        b = jax.random.uniform(kb, (fan_out,), jnp.float32, -bound, bound)
        params.append((w, b))
    return tuple(params)


def reference_forward(x, params):
    """Pure-JAX f32 reference matching the PyTorch module in eval mode."""
    (w1, b1), (w2, b2), (w3, b3) = params
    silu = lambda t: t * jax.nn.sigmoid(t)
    h = silu(x)
    h = silu(h @ w1.T + b1)        # dropout = identity
    h = h @ w2.T + b2              # dropout = identity
    return h @ w3.T + b3


if __name__ == "__main__":
    key = jax.random.PRNGKey(0)
    batch, input_dim = 8, 32

    kx, kp = jax.random.split(key)
    x = jax.random.normal(kx, (batch, input_dim), jnp.float32)
    params = init_params(kp, input_dim)

    out = jax.block_until_ready(binary_mlp_forward(x, params))
    ref = reference_forward(x, params)

    assert out.shape == (batch, 1)
    # bf16 MXU operands -> relaxed tolerance vs the pure-f32 reference.
    assert jnp.allclose(out, ref, atol=2e-2, rtol=2e-2), float(jnp.max(jnp.abs(out - ref)))

    print("KERNEL_OK")
</pallas_src>

<mosaic_0001>
module attributes {stable_mosaic.version = 11 : i64} {
  func.func @_mlp_kernel(%arg0: i32, %arg1: memref<32x128xf32, #tpu.memory_space<vmem>>, %arg2: memref<384x32xbf16, #tpu.memory_space<vmem>>, %arg3: memref<384x1xf32, #tpu.memory_space<vmem>>, %arg4: memref<384x1xf32, #tpu.memory_space<vmem>>, %arg5: memref<1x1xf32, #tpu.memory_space<vmem>>, %arg6: memref<1x128xf32, #tpu.memory_space<vmem>>) attributes {dimension_semantics = [#tpu.dimension_semantics<parallel>], iteration_bounds = array<i64: 1>, scalar_prefetch = 0 : i64, scratch_operands = 0 : i64, tpu.core_type = #tpu.core_type<tc>, window_params = [{transform_indices = @transform_0, window_bounds = array<i64: 32, 128>}, {pipeline_mode = #tpu.pipeline_mode<synchronous>, transform_indices = @transform_1, window_bounds = array<i64: 384, 32>}, {pipeline_mode = #tpu.pipeline_mode<synchronous>, transform_indices = @transform_2, window_bounds = array<i64: 384, 1>}, {pipeline_mode = #tpu.pipeline_mode<synchronous>, transform_indices = @transform_3, window_bounds = array<i64: 384, 1>}, {pipeline_mode = #tpu.pipeline_mode<synchronous>, transform_indices = @transform_4, window_bounds = array<i64: 1, 1>}, {transform_indices = @transform_5, window_bounds = array<i64: 1, 128>}]} {
    %c0 = arith.constant 0 : index
    %c0_0 = arith.constant 0 : index
    %0 = vector.load %arg1[%c0, %c0_0] : memref<32x128xf32, #tpu.memory_space<vmem>>, vector<32x128xf32>
    %1 = arith.negf %0 : vector<32x128xf32>
    %2 = math.exp %1 : vector<32x128xf32>
    %cst = arith.constant 1.000000e+00 : f32
    %3 = vector.broadcast %cst : f32 to vector<32x128xf32>
    %4 = arith.addf %3, %2 : vector<32x128xf32>
    %5 = arith.divf %3, %4 : vector<32x128xf32>
    %6 = arith.mulf %0, %5 : vector<32x128xf32>
    %c0_1 = arith.constant 0 : index
    %c0_2 = arith.constant 0 : index
    %7 = vector.load %arg2[%c0_1, %c0_2] : memref<384x32xbf16, #tpu.memory_space<vmem>>, vector<384x32xbf16>
    %8 = arith.truncf %6 : vector<32x128xf32> to vector<32x128xbf16>
    %cst_3 = arith.constant dense<0.000000e+00> : vector<384x128xf32>
    %9 = tpu.matmul %7, %8, %cst_3 {dimension_numbers = #tpu.dot_dimension_numbers<[1], [0], [0], [1], [0, 0, 1, 1], [], []>} : vector<384x32xbf16>, vector<32x128xbf16>, vector<384x128xf32> -> vector<384x128xf32>
    %c0_4 = arith.constant 0 : index
    %c0_5 = arith.constant 0 : index
    %10 = vector.load %arg3[%c0_4, %c0_5] : memref<384x1xf32, #tpu.memory_space<vmem>>, vector<384x1xf32>
    %11 = vector.broadcast %10 : vector<384x1xf32> to vector<384x128xf32>
    %12 = arith.addf %9, %11 : vector<384x128xf32>
    %13 = arith.negf %12 : vector<384x128xf32>
    %14 = math.exp %13 : vector<384x128xf32>
    %cst_6 = arith.constant 1.000000e+00 : f32
    %15 = vector.broadcast %cst_6 : f32 to vector<384x128xf32>
    %16 = arith.addf %15, %14 : vector<384x128xf32>
    %17 = arith.divf %15, %16 : vector<384x128xf32>
    %18 = arith.mulf %12, %17 : vector<384x128xf32>
    %c0_7 = arith.constant 0 : index
    %c0_8 = arith.constant 0 : index
    %19 = vector.load %arg4[%c0_7, %c0_8] : memref<384x1xf32, #tpu.memory_space<vmem>>, vector<384x1xf32>
    %20 = vector.broadcast %19 : vector<384x1xf32> to vector<384x128xf32>
    %21 = arith.mulf %18, %20 : vector<384x128xf32>
    %cst_9 = arith.constant dense<0.000000e+00> : vector<128xf32>
    %22 = vector.multi_reduction <add>, %21, %cst_9 [0] : vector<384x128xf32> to vector<128xf32>
    %23 = vector.shape_cast %22 : vector<128xf32> to vector<1x128xf32>
    %c0_10 = arith.constant 0 : index
    %c0_11 = arith.constant 0 : index
    %24 = vector.load %arg5[%c0_10, %c0_11] : memref<1x1xf32, #tpu.memory_space<vmem>>, vector<1x1xf32>
    %25 = vector.broadcast %24 : vector<1x1xf32> to vector<1x128xf32>
    %26 = arith.addf %23, %25 : vector<1x128xf32>
    %c0_12 = arith.constant 0 : index
    %c0_13 = arith.constant 0 : index
    %27 = vector.load %arg6[%c0_12, %c0_13] : memref<1x128xf32, #tpu.memory_space<vmem>>, vector<1x128xf32>
    tpu.vector_store %arg6[%c0_12, %c0_13], %26 {strides = array<i32>} : memref<1x128xf32, #tpu.memory_space<vmem>>, vector<1x128xf32>,
    return
  }
  func.func @transform_0(%arg0: i32) -> (i32, i32) {
    %c0_i32 = arith.constant 0 : i32
    %c0_i32_0 = arith.constant 0 : i32
    return %c0_i32, %arg0 : i32, i32
  }
  func.func @transform_1(%arg0: i32) -> (i32, i32) {
    %c0_i32 = arith.constant 0 : i32
    %c0_i32_0 = arith.constant 0 : i32
    %c0_i32_1 = arith.constant 0 : i32
    return %c0_i32, %c0_i32_0 : i32, i32
  }
  func.func @transform_2(%arg0: i32) -> (i32, i32) {
    %c0_i32 = arith.constant 0 : i32
    %c0_i32_0 = arith.constant 0 : i32
    %c0_i32_1 = arith.constant 0 : i32
    return %c0_i32, %c0_i32_0 : i32, i32
  }
  func.func @transform_3(%arg0: i32) -> (i32, i32) {
    %c0_i32 = arith.constant 0 : i32
    %c0_i32_0 = arith.constant 0 : i32
    %c0_i32_1 = arith.constant 0 : i32
    return %c0_i32, %c0_i32_0 : i32, i32
  }
  func.func @transform_4(%arg0: i32) -> (i32, i32) {
    %c0_i32 = arith.constant 0 : i32
    %c0_i32_0 = arith.constant 0 : i32
    %c0_i32_1 = arith.constant 0 : i32
    return %c0_i32, %c0_i32_0 : i32, i32
  }
  func.func @transform_5(%arg0: i32) -> (i32, i32) {
    %c0_i32 = arith.constant 0 : i32
    %c0_i32_0 = arith.constant 0 : i32
    return %c0_i32, %arg0 : i32, i32
  }
}

</mosaic_0001>

<bundles_post_ra>
// kernel: tpu_custom_call.1
= control target key start
LH: loop header
LB: loop body
LE: loop exit
PB: predicated region body
PF: predicated region fallthrough
CT: control target
= control target key end

     0   :  { %s2805_s0 = inlined_call_operand.vmem [shape: f32[32,128], index: 0, kind: input, shape index: {}]   ;;  %s2806_s1 = inlined_call_operand.vmem [shape: bf16[384,32], index: 1, kind: input, shape index: {}]   ;;  %s2807_s2 = inlined_call_operand.vmem [shape: f32[384,1], index: 2, kind: input, shape index: {}]   ;;  %s2808_s3 = inlined_call_operand.vmem [shape: f32[384,1], index: 3, kind: input, shape index: {}]   ;;  %s2809_s4 = inlined_call_operand.<no memory space> [shape: f32[1,1], index: 4, kind: input, shape index: {}]   ;;  %s2810_s5 = inlined_call_operand.hbm [shape: f32[1,128], index: 5, kind: output, shape index: {}]  }
   0x1   :  { %v10_v0 = vstv %s2809_s4 }
   0x2   :  { %11 = vst [vmem:[#allocation2] sm:$0x1] %v10_v0 }
   0x3   :  { %v108_v1 = vld [vmem:[%s2807_s2 + $0x10] sm:$0xff]  ;;  %v106_v2 = vld [vmem:[%s2807_s2] sm:$0xff]  ;;  %v2005_v3 = vmov 0   ;;  %v109_v4 = vld [vmem:[%s2807_s2 + $0x18] sm:$0xff]  ;;  %vm514_vm0 = vcmask 261120  }
   0x4   :  { %1748 = vset.pattern.permute.xlu1 %v2005_v3  ;;  %1747 = vset.pattern.permute.xlu0 %v2005_v3  ;;  %v107_v5 = vld [vmem:[%s2807_s2 + $0x8] sm:$0xff]  ;;  %v24_v6 = vld [vmem:[%s2805_s0] sm:$0xff]  ;;  %v26_v12 = vld [vmem:[%s2805_s0 + $0x10] sm:$0xff] }
   0x5   :  { %166 = vperm.xlu1 %1748, %v108_v1   ;;  %156 = vperm.xlu0 %1747, %v106_v2   ;;  %v25_v7 = vld [vmem:[%s2805_s0 + $0x8] sm:$0xff]  ;;  %v1563_v9 = vmul.f32 -1.442695, %v24_v6  ;;  %v110_v11 = vld [vmem:[%s2807_s2 + $0x20] sm:$0xff]  ;;  %v27_v13 = vld [vmem:[%s2805_s0 + $0x18] sm:$0xff] }
   0x6   :  { %v111_v8 = vld [vmem:[%s2807_s2 + $0x28] sm:$0xff]  ;;  %v1564_v10 = vmul.f32 -1.442695, %v25_v7  ;;  %v1565_v14 = vmul.f32 -1.442695, %v26_v12  ;;  %v1749_v16 = vld [vmem:[%s2806_s1] sm:$0xff]  }
   0x7   :  { %1773 = vpow2.f32 %v1563_v9  ;;  %v1566_v15 = vmul.f32 -1.442695, %v27_v13  ;;  %v113_v17 = vld [vmem:[%s2807_s2 + $0x38] sm:$0xff]  ;;  %v1750_v18 = vld [vmem:[%s2806_s1 + $0x60] sm:$0xff]   ;;  %v112_v19 = vld [vmem:[%s2807_s2 + $0x30] sm:$0xff]  ;;  %1693 = vmatprep.mubr.msk.bf16.mxu0 %vm514_vm0, %v1749_v16 }
   0x8   :  { %1775 = vpow2.f32 %v1564_v10  ;;  %1717 = vmatprep.mubr.msk.bf16.mxu1 %vm514_vm0, %v1750_v18  ;;  %v115_v20 = vld [vmem:[%s2807_s2 + $0x48] sm:$0xff]  ;;  %v114_v21 = vld [vmem:[%s2807_s2 + $0x40] sm:$0xff]  ;;  %v117_v23 = vld [vmem:[%s2807_s2 + $0x58] sm:$0xff] }
   0x9   :  { %171 = vperm.xlu1 %1748, %v109_v4   ;;  %161 = vperm.xlu0 %1747, %v107_v5   ;;  %1777 = vpow2.f32 %v1565_v14  ;;  %v116_v25 = vld [vmem:[%s2807_s2 + $0x50] sm:$0xff]  ;;  %v119_v32 = vld [vmem:[%s2807_s2 + $0x68] sm:$0xff]  ;;  %v118_v33 = vld [vmem:[%s2807_s2 + $0x60] sm:$0xff] }
   0xa   :  { %1779 = vpow2.f32 %v1566_v15  ;;  %v121_v34 = vld [vmem:[%s2807_s2 + $0x78] sm:$0xff]  ;;  %v120_v35 = vld [vmem:[%s2807_s2 + $0x70] sm:$0xff]  ;;  %v123_v36 = vld [vmem:[%s2807_s2 + $0x88] sm:$0xff] }
   0xb   :  { %v122_v38 = vld [vmem:[%s2807_s2 + $0x80] sm:$0xff]  ;;  %v125_v47 = vld [vmem:[%s2807_s2 + $0x98] sm:$0xff]  ;;  %v124_v49 = vld [vmem:[%s2807_s2 + $0x90] sm:$0xff] }
   0xc   :  { %v1751_v50 = vld [vmem:[%s2806_s1 + $0x8] sm:$0xff]   ;;  %v126_v53 = vld [vmem:[%s2807_s2 + $0xa0] sm:$0xff]  ;;  %v1753_v54 = vld [vmem:[%s2806_s1 + $0x10] sm:$0xff]  }
   0xd   :  { %181 = vperm.xlu1 %1748, %v111_v8   ;;  %176 = vperm.xlu0 %1747, %v110_v11   ;;  %v1752_v51 = vld [vmem:[%s2806_s1 + $0x68] sm:$0xff]   ;;  %v1754_v55 = vld [vmem:[%s2806_s1 + $0x70] sm:$0xff]   ;;  %v129_v56 = vld [vmem:[%s2807_s2 + $0xb8] sm:$0xff] }
   0xe   :  { %v127_v52 = vld [vmem:[%s2807_s2 + $0xa8] sm:$0xff]  ;;  %v128_v57 = vld [vmem:[%s2807_s2 + $0xb0] sm:$0xff]  ;;  %v1755_v58 = vld [vmem:[%s2806_s1 + $0x18] sm:$0xff]  }
   0xf   :  { %v1756_v59 = vld [vmem:[%s2806_s1 + $0x78] sm:$0xff]   ;;  %v131_v60 = vld [vmem:[%s2807_s2 + $0xc8] sm:$0xff]  ;;  %v130_v61 = vld [vmem:[%s2807_s2 + $0xc0] sm:$0xff] }
  0x10   :  { %v1757_v62 = vld [vmem:[%s2806_s1 + $0x20] sm:$0xff]   ;;  %v133_v0 = vld [vmem:[%s2807_s2 + $0xd8] sm:$0xff]  ;;  %v132_v1 = vld [vmem:[%s2807_s2 + $0xd0] sm:$0xff] }
  0x11   :  { %191 = vperm.xlu1 %1748, %v113_v17   ;;  %186 = vperm.xlu0 %1747, %v112_v19   ;;  %v1774_v22 = vpop.eup %1773  ;;  %v1758_v63 = vld [vmem:[%s2806_s1 + $0x80] sm:$0xff]   ;;  %v1759_v2 = vld [vmem:[%s2806_s1 + $0x28] sm:$0xff]  }
  0x12   :  { %v1776_v24 = vpop.eup %1775  ;;  %v40_v26 = vadd.f32 1.0, %v1774_v22 }
  0x13   :  { %v1778_v27 = vpop.eup %1777  ;;  %v41_v28 = vadd.f32 1.0, %v1776_v24 }
  0x14   :  { %v1780_v29 = vpop.eup %1779  ;;  %1781 = vrcp.f32 %v40_v26  ;;  %v42_v30 = vadd.f32 1.0, %v1778_v27 }
  0x15   :  { %201 = vperm.xlu1 %1748, %v115_v20   ;;  %196 = vperm.xlu0 %1747, %v114_v21   ;;  %1783 = vrcp.f32 %v41_v28  ;;  %v43_v31 = vadd.f32 1.0, %v1780_v29 }
  0x16   :  { %1785 = vrcp.f32 %v42_v30 }
  0x17   :  { %1787 = vrcp.f32 %v43_v31 }
  0x19   :  { %211 = vperm.xlu1 %1748, %v117_v23   ;;  %206 = vperm.xlu0 %1747, %v116_v25  }
  0x1d   :  { %221 = vperm.xlu1 %1748, %v119_v32   ;;  %216 = vperm.xlu0 %1747, %v118_v33  }
  0x1e   :  { %v1782_v37 = vpop.eup %1781 }
  0x1f   :  { %v1784_v39 = vpop.eup %1783  ;;  %v52_v40 = vmul.f32 %v1782_v37, %v24_v6 }
  0x20   :  { %v1786_v41 = vpop.eup %1785  ;;  %v53_v42 = vmul.f32 %v1784_v39, %v25_v7 }
  0x21   :  { %231 = vperm.xlu1 %1748, %v121_v34   ;;  %226 = vperm.xlu0 %1747, %v120_v35   ;;  %v1788_v43 = vpop.eup %1787  ;;  %v54_v44 = vmul.f32 %v1786_v41, %v26_v12 }
  0x22   :  { %v104_v45 = vpack.c.bf16 %v53_v42, %v52_v40  ;;  %v55_v46 = vmul.f32 %v1788_v43, %v27_v13 }
  0x24   :  { %1689 = vmatprep.subr.bf16.mxu0 %v104_v45  ;;  %1741 = vmatprep.subr.bf16.mxu1 %v104_v45  ;;  %v105_v48 = vpack.c.bf16 %v55_v46, %v54_v44 }
  0x25   :  { %241 = vperm.xlu1 %1748, %v123_v36   ;;  %236 = vperm.xlu0 %1747, %v122_v38  }
  0x26   :  { %1690 = vmatpush3.bf16.msra.mxu0 %v104_v45  ;;  %1743 = vmatpush3.bf16.msra.mxu1 %v104_v45 }
  0x27   :  { %1691 = vmatprep.subr.bf16.mxu0 %v105_v48  ;;  %1742 = vmatprep.subr.bf16.mxu1 %v105_v48 }
  0x29   :  { %251 = vperm.xlu1 %1748, %v125_v47   ;;  %246 = vperm.xlu0 %1747, %v124_v49  }
  0x2a   :  { %1692 = vmatpush3.bf16.msra.mxu0 %v105_v48  ;;  %1744 = vmatpush3.bf16.msra.mxu1 %v105_v48 }
  0x2d   :  { %261 = vperm.xlu1 %1748, %v127_v52   ;;  %256 = vperm.xlu0 %1747, %v126_v53  }
  0x2e   :  { %1694 = vmatmul.mubr.msk.bf16.vlgmr.msra.gmra.mrb[0].mxu0 %vm514_vm0, %v1751_v50  ;;  %1718 = vmatmul.mubr.msk.bf16.vlgmr.msra.gmra.mrb[0].mxu1 %vm514_vm0, %v1752_v51 }
  0x2f   :  { %1697 = vmatprep.mubr.msk.bf16.mxu0 %vm514_vm0, %v1753_v54  ;;  %1721 = vmatprep.mubr.msk.bf16.mxu1 %vm514_vm0, %v1754_v55 }
  0x31   :  { %271 = vperm.xlu1 %1748, %v129_v56   ;;  %266 = vperm.xlu0 %1747, %v128_v57  }
  0x35   :  { %281 = vperm.xlu1 %1748, %v131_v60   ;;  %276 = vperm.xlu0 %1747, %v130_v61  }
  0x36   :  { %1698 = vmatmul.mubr.msk.bf16.gmra.mrb[4].mxu0 %vm514_vm0, %v1755_v58  ;;  %1722 = vmatmul.mubr.msk.bf16.gmra.mrb[4].mxu1 %vm514_vm0, %v1756_v59 }
  0x37   :  { %1701 = vmatprep.mubr.msk.bf16.mxu0 %vm514_vm0, %v1757_v62  ;;  %1725 = vmatprep.mubr.msk.bf16.mxu1 %vm514_vm0, %v1758_v63 }
  0x39   :  { %291 = vperm.xlu1 %1748, %v133_v0   ;;  %286 = vperm.xlu0 %1747, %v132_v1  }
  0x3a   :  { %12 = vsyncpa [#allocation4], 0  ;;  %v1760_v3 = vld [vmem:[%s2806_s1 + $0x88] sm:$0xff]   ;;  %v134_v5 = vld [vmem:[%s2807_s2 + $0xe0] sm:$0xff] }
  0x3b   :  { %v135_v4 = vld [vmem:[%s2807_s2 + $0xe8] sm:$0xff]  ;;  %v1761_v6 = vld [vmem:[%s2806_s1 + $0x30] sm:$0xff]   ;;  %v137_v8 = vld [vmem:[%s2807_s2 + $0xf8] sm:$0xff] }
  0x3c   :  { %v1762_v7 = vld [vmem:[%s2806_s1 + $0x90] sm:$0xff]   ;;  %v1763_v10 = vld [vmem:[%s2806_s1 + $0x38] sm:$0xff]   ;;  %v139_v12 = vld [vmem:[%s2807_s2 + $0x108] sm:$0xff] }
  0x3d   :  { %301 = vperm.xlu1 %1748, %v135_v4   ;;  %296 = vperm.xlu0 %1747, %v134_v5   ;;  %v136_v9 = vld [vmem:[%s2807_s2 + $0xf0] sm:$0xff]  ;;  %v1764_v11 = vld [vmem:[%s2806_s1 + $0x98] sm:$0xff]   ;;  %v138_v13 = vld [vmem:[%s2807_s2 + $0x100] sm:$0xff] }
  0x3e   :  { %1702 = vmatmul.mubr.msk.bf16.gmra.mrb[8].mxu0 %vm514_vm0, %v1759_v2  ;;  %1726 = vmatmul.mubr.msk.bf16.gmra.mrb[8].mxu1 %vm514_vm0, %v1760_v3  ;;  %v1765_v14 = vld [vmem:[%s2806_s1 + $0x40] sm:$0xff]   ;;  %v141_v16 = vld [vmem:[%s2807_s2 + $0x118] sm:$0xff]  ;;  %v140_v17 = vld [vmem:[%s2807_s2 + $0x110] sm:$0xff] }
  0x3f   :  { %1705 = vmatprep.mubr.msk.bf16.mxu0 %vm514_vm0, %v1761_v6  ;;  %1729 = vmatprep.mubr.msk.bf16.mxu1 %vm514_vm0, %v1762_v7  ;;  %v1766_v15 = vld [vmem:[%s2806_s1 + $0xa0] sm:$0xff]   ;;  %v1767_v18 = vld [vmem:[%s2806_s1 + $0x48] sm:$0xff]   ;;  %v1769_v22 = vld [vmem:[%s2806_s1 + $0x50] sm:$0xff]  }
  0x40   :  { %v1768_v19 = vld [vmem:[%s2806_s1 + $0xa8] sm:$0xff]   ;;  %v142_v21 = vld [vmem:[%s2807_s2 + $0x120] sm:$0xff]  ;;  %v1770_v23 = vld [vmem:[%s2806_s1 + $0xb0] sm:$0xff]  }
  0x41   :  { %311 = vperm.xlu1 %1748, %v137_v8   ;;  %306 = vperm.xlu0 %1747, %v136_v9   ;;  %v143_v20 = vld [vmem:[%s2807_s2 + $0x128] sm:$0xff]  ;;  %v145_v24 = vld [vmem:[%s2807_s2 + $0x138] sm:$0xff]  ;;  %v144_v25 = vld [vmem:[%s2807_s2 + $0x130] sm:$0xff] }
  0x42   :  { %v1771_v26 = vld [vmem:[%s2806_s1 + $0x58] sm:$0xff]   ;;  %v147_v28 = vld [vmem:[%s2807_s2 + $0x148] sm:$0xff]  ;;  %v146_v29 = vld [vmem:[%s2807_s2 + $0x140] sm:$0xff] }
  0x43   :  { %v1772_v27 = vld [vmem:[%s2806_s1 + $0xb8] sm:$0xff]   ;;  %v148_v31 = vld [vmem:[%s2807_s2 + $0x150] sm:$0xff]  ;;  %v151_v32 = vld [vmem:[%s2807_s2 + $0x168] sm:$0xff] }
  0x44   :  { %v149_v30 = vld [vmem:[%s2807_s2 + $0x158] sm:$0xff]  ;;  %v150_v33 = vld [vmem:[%s2807_s2 + $0x160] sm:$0xff]  ;;  %v152_v35 = vld [vmem:[%s2807_s2 + $0x170] sm:$0xff] }
  0x45   :  { %321 = vperm.xlu1 %1748, %v139_v12   ;;  %316 = vperm.xlu0 %1747, %v138_v13   ;;  %v153_v34 = vld [vmem:[%s2807_s2 + $0x178] sm:$0xff]  ;;  %v1149_v36 = vld [vmem:[%s2808_s3 + $0x8] sm:$0xff]  ;;  %v1148_v37 = vld [vmem:[%s2808_s3] sm:$0xff] }
  0x46   :  { %1706 = vmatmul.mubr.msk.bf16.gmra.mrb[12].mxu0 %vm514_vm0, %v1763_v10  ;;  %1730 = vmatmul.mubr.msk.bf16.gmra.mrb[12].mxu1 %vm514_vm0, %v1764_v11  ;;  %v1151_v38 = vld [vmem:[%s2808_s3 + $0x18] sm:$0xff]  ;;  %v1150_v39 = vld [vmem:[%s2808_s3 + $0x10] sm:$0xff]  ;;  %v1153_v40 = vld [vmem:[%s2808_s3 + $0x28] sm:$0xff] }
  0x47   :  { %1709 = vmatprep.mubr.msk.bf16.mxu0 %vm514_vm0, %v1765_v14  ;;  %1733 = vmatprep.mubr.msk.bf16.mxu1 %vm514_vm0, %v1766_v15  ;;  %v1152_v41 = vld [vmem:[%s2808_s3 + $0x20] sm:$0xff]  ;;  %v1155_v42 = vld [vmem:[%s2808_s3 + $0x38] sm:$0xff]  ;;  %v1154_v43 = vld [vmem:[%s2808_s3 + $0x30] sm:$0xff] }
  0x48   :  { %v1157_v44 = vld [vmem:[%s2808_s3 + $0x48] sm:$0xff]  ;;  %v1156_v45 = vld [vmem:[%s2808_s3 + $0x40] sm:$0xff]  ;;  %v1159_v46 = vld [vmem:[%s2808_s3 + $0x58] sm:$0xff] }
  0x49   :  { %331 = vperm.xlu1 %1748, %v141_v16   ;;  %326 = vperm.xlu0 %1747, %v140_v17   ;;  %v1158_v47 = vld [vmem:[%s2808_s3 + $0x50] sm:$0xff]  ;;  %v1161_v48 = vld [vmem:[%s2808_s3 + $0x68] sm:$0xff]  ;;  %v1160_v49 = vld [vmem:[%s2808_s3 + $0x60] sm:$0xff] }
  0x4a   :  { %v1163_v50 = vld [vmem:[%s2808_s3 + $0x78] sm:$0xff]  ;;  %v1162_v51 = vld [vmem:[%s2808_s3 + $0x70] sm:$0xff]  ;;  %v1165_v54 = vld [vmem:[%s2808_s3 + $0x88] sm:$0xff] }
  0x4b   :  { %v1164_v55 = vld [vmem:[%s2808_s3 + $0x80] sm:$0xff]  ;;  %v1167_v56 = vld [vmem:[%s2808_s3 + $0x98] sm:$0xff]  ;;  %v1166_v57 = vld [vmem:[%s2808_s3 + $0x90] sm:$0xff] }
  0x4c   :  { %v1169_v60 = vld [vmem:[%s2808_s3 + $0xa8] sm:$0xff]  ;;  %v1168_v61 = vld [vmem:[%s2808_s3 + $0xa0] sm:$0xff]  ;;  %v1171_v0 = vld [vmem:[%s2808_s3 + $0xb8] sm:$0xff] }
  0x4d   :  { %341 = vperm.xlu1 %1748, %v143_v20   ;;  %336 = vperm.xlu0 %1747, %v142_v21   ;;  %v1170_v1 = vld [vmem:[%s2808_s3 + $0xb0] sm:$0xff]  ;;  %v1173_v2 = vld [vmem:[%s2808_s3 + $0xc8] sm:$0xff]  ;;  %v1172_v3 = vld [vmem:[%s2808_s3 + $0xc0] sm:$0xff] }
  0x4e   :  { %1710 = vmatmul.mubr.msk.bf16.gmra.mrb[16].mxu0 %vm514_vm0, %v1767_v18  ;;  %1734 = vmatmul.mubr.msk.bf16.gmra.mrb[16].mxu1 %vm514_vm0, %v1768_v19  ;;  %v1175_v6 = vld [vmem:[%s2808_s3 + $0xd8] sm:$0xff]  ;;  %v1174_v7 = vld [vmem:[%s2808_s3 + $0xd0] sm:$0xff]  ;;  %v1177_v10 = vld [vmem:[%s2808_s3 + $0xe8] sm:$0xff] }
  0x4f   :  { %1713 = vmatprep.mubr.msk.bf16.mxu0 %vm514_vm0, %v1769_v22  ;;  %1737 = vmatprep.mubr.msk.bf16.mxu1 %vm514_vm0, %v1770_v23  ;;  %v1176_v11 = vld [vmem:[%s2808_s3 + $0xe0] sm:$0xff]  ;;  %v1179_v12 = vld [vmem:[%s2808_s3 + $0xf8] sm:$0xff]  ;;  %v1178_v13 = vld [vmem:[%s2808_s3 + $0xf0] sm:$0xff] }
  0x50   :  { %v1181_v16 = vld [vmem:[%s2808_s3 + $0x108] sm:$0xff]  ;;  %v1180_v17 = vld [vmem:[%s2808_s3 + $0x100] sm:$0xff]  ;;  %v1183_v20 = vld [vmem:[%s2808_s3 + $0x118] sm:$0xff] }
  0x51   :  { %351 = vperm.xlu1 %1748, %v145_v24   ;;  %346 = vperm.xlu0 %1747, %v144_v25   ;;  %v1182_v21 = vld [vmem:[%s2808_s3 + $0x110] sm:$0xff]  ;;  %v1185_v22 = vld [vmem:[%s2808_s3 + $0x128] sm:$0xff]  ;;  %v1184_v23 = vld [vmem:[%s2808_s3 + $0x120] sm:$0xff] }
  0x55   :  { %361 = vperm.xlu1 %1748, %v147_v28   ;;  %356 = vperm.xlu0 %1747, %v146_v29  }
  0x56   :  { %1714 = vmatmul.mubr.msk.bf16.gmra.mrb[20].mxu0 %vm514_vm0, %v1771_v26  ;;  %1738 = vmatmul.mubr.msk.bf16.gmra.mrb[20].mxu1 %vm514_vm0, %v1772_v27  ;;  %v1187_v26 = vld [vmem:[%s2808_s3 + $0x138] sm:$0xff]  ;;  %v1186_v27 = vld [vmem:[%s2808_s3 + $0x130] sm:$0xff] }
  0x59   :  { %371 = vperm.xlu1 %1748, %v149_v30   ;;  %366 = vperm.xlu0 %1747, %v148_v31   ;;  %v1189_v30 = vld [vmem:[%s2808_s3 + $0x148] sm:$0xff]  ;;  %v1188_v31 = vld [vmem:[%s2808_s3 + $0x140] sm:$0xff] }
  0x5d   :  { %381 = vperm.xlu1 %1748, %v151_v32   ;;  %376 = vperm.xlu0 %1747, %v150_v33   ;;  %v1191_v32 = vld [vmem:[%s2808_s3 + $0x158] sm:$0xff]  ;;  %v1190_v33 = vld [vmem:[%s2808_s3 + $0x150] sm:$0xff] }
  0x61   :  { %391 = vperm.xlu1 %1748, %v153_v34   ;;  %386 = vperm.xlu0 %1747, %v152_v35  }
  0x65   :  { %1203 = vperm.xlu1 %1748, %v1149_v36   ;;  %1198 = vperm.xlu0 %1747, %v1148_v37   ;;  %v1193_v36 = vld [vmem:[%s2808_s3 + $0x168] sm:$0xff]  ;;  %v1192_v37 = vld [vmem:[%s2808_s3 + $0x160] sm:$0xff] }
  0x69   :  { %1213 = vperm.xlu1 %1748, %v1151_v38   ;;  %1208 = vperm.xlu0 %1747, %v1150_v39  }
  0x6d   :  { %1223 = vperm.xlu1 %1748, %v1153_v40   ;;  %1218 = vperm.xlu0 %1747, %v1152_v41   ;;  %v1195_v40 = vld [vmem:[%s2808_s3 + $0x178] sm:$0xff]  ;;  %v1194_v41 = vld [vmem:[%s2808_s3 + $0x170] sm:$0xff]  ;;  %s2006_s3 = smov [#allocation3]  }
  0x6e   :  { %s1555_s18 = sshll.u32 %s2006_s3, 4  ;;  %s1556_s18 = int_to_ptr.vmem [resolvable:$true] %s1555_s18 }
  0x6f   :  { %s1981_s19 = scalar_lea.vmem %s1556_s18, 16  ;;  %s1985_s0 = scalar_lea.vmem %s1556_s18, 32 }
  0x70   :  { %p1982_p0 = scmp.ne.s32.totalorder %s1556_s18, %s1981_s19  ;;  %p1986_p1 = scmp.lt.s32.totalorder %s1556_s18, %s1556_s18 }
  0x71   :  { %1233 = vperm.xlu1 %1748, %v1155_v42   ;;  %1228 = vperm.xlu0 %1747, %v1154_v43   ;;  %v1537_v42 = vld [vmem:[#allocation2] sm:$0x1]  ;;  %p1987_p2 = scmp.lt.s32.totalorder %s1985_s0, %s1981_s19 }
  0x73   :  { %p1988_p3 = por %p1987_p2, %p1986_p1 }
  0x75   :  { %1243 = vperm.xlu1 %1748, %v1157_v44   ;;  %1238 = vperm.xlu0 %1747, %v1156_v45   ;;  %p1989_p4 = pnand %p1988_p3, %p1982_p0 }
  0x79   :  { %1253 = vperm.xlu1 %1748, %v1159_v46   ;;  %1248 = vperm.xlu0 %1747, %v1158_v47  }
  0x7d   :  { %1263 = vperm.xlu1 %1748, %v1161_v48   ;;  %1258 = vperm.xlu0 %1747, %v1160_v49  }
  0x81   :  { %1273 = vperm.xlu1 %1748, %v1163_v50   ;;  %1268 = vperm.xlu0 %1747, %v1162_v51  }
  0x84   :  { %v2340_v52 = vpop.permute.xlu1 %166  ;;  %v2342_v53 = vpop.permute.xlu0 %156 }
  0x85   :  { %1283 = vperm.xlu1 %1748, %v1165_v54   ;;  %1278 = vperm.xlu0 %1747, %v1164_v55  }
  0x88   :  { %v2356_v58 = vpop.permute.xlu1 %171  ;;  %v2358_v59 = vpop.permute.xlu0 %161 }
  0x89   :  { %1293 = vperm.xlu1 %1748, %v1167_v56   ;;  %1288 = vperm.xlu0 %1747, %v1166_v57  }
  0x8c   :  { %v2366_v62 = vpop.permute.xlu1 %181  ;;  %v2368_v63 = vpop.permute.xlu0 %176 }
  0x8d   :  { %1303 = vperm.xlu1 %1748, %v1169_v60   ;;  %1298 = vperm.xlu0 %1747, %v1168_v61  }
  0x90   :  { %v2382_v4 = vpop.permute.xlu1 %191  ;;  %v2384_v5 = vpop.permute.xlu0 %186 }
  0x91   :  { %1313 = vperm.xlu1 %1748, %v1171_v0   ;;  %1308 = vperm.xlu0 %1747, %v1170_v1  }
  0x94   :  { %v2392_v8 = vpop.permute.xlu1 %201  ;;  %v2394_v9 = vpop.permute.xlu0 %196 }
  0x95   :  { %1323 = vperm.xlu1 %1748, %v1173_v2   ;;  %1318 = vperm.xlu0 %1747, %v1172_v3  }
  0x98   :  { %v2408_v14 = vpop.permute.xlu1 %211  ;;  %v2410_v15 = vpop.permute.xlu0 %206 }
  0x99   :  { %1333 = vperm.xlu1 %1748, %v1175_v6   ;;  %1328 = vperm.xlu0 %1747, %v1174_v7  }
  0x9c   :  { %v2418_v18 = vpop.permute.xlu1 %221  ;;  %v2420_v19 = vpop.permute.xlu0 %216 }
  0x9d   :  { %1343 = vperm.xlu1 %1748, %v1177_v10   ;;  %1338 = vperm.xlu0 %1747, %v1176_v11  }
  0xa0   :  { %v2434_v24 = vpop.permute.xlu1 %231  ;;  %v2436_v25 = vpop.permute.xlu0 %226 }
  0xa1   :  { %1353 = vperm.xlu1 %1748, %v1179_v12   ;;  %1348 = vperm.xlu0 %1747, %v1178_v13  }
  0xa4   :  { %v2444_v28 = vpop.permute.xlu1 %241  ;;  %v2446_v29 = vpop.permute.xlu0 %236 }
  0xa5   :  { %1363 = vperm.xlu1 %1748, %v1181_v16   ;;  %1358 = vperm.xlu0 %1747, %v1180_v17  }
  0xa8   :  { %v2460_v34 = vpop.permute.xlu1 %251  ;;  %v2462_v35 = vpop.permute.xlu0 %246 }
  0xa9   :  { %1373 = vperm.xlu1 %1748, %v1183_v20   ;;  %1368 = vperm.xlu0 %1747, %v1182_v21  }
  0xac   :  { %v2470_v38 = vpop.permute.xlu1 %261  ;;  %v2472_v39 = vpop.permute.xlu0 %256 }
  0xad   :  { %1383 = vperm.xlu1 %1748, %v1185_v22   ;;  %1378 = vperm.xlu0 %1747, %v1184_v23  }
  0xb0   :  { %v2480_v43 = vpop.permute.xlu1 %271  ;;  %v2482_v44 = vpop.permute.xlu0 %266 }
  0xb1   :  { %1393 = vperm.xlu1 %1748, %v1187_v26   ;;  %1388 = vperm.xlu0 %1747, %v1186_v27  }
  0xb4   :  { %v282_v45 = vpop.permute.xlu1 %281  ;;  %v277_v46 = vpop.permute.xlu0 %276 }
  0xb5   :  { %1403 = vperm.xlu1 %1748, %v1189_v30   ;;  %1398 = vperm.xlu0 %1747, %v1188_v31  }
  0xb8   :  { %v292_v47 = vpop.permute.xlu1 %291  ;;  %v287_v48 = vpop.permute.xlu0 %286 }
  0xb9   :  { %1413 = vperm.xlu1 %1748, %v1191_v32   ;;  %1408 = vperm.xlu0 %1747, %v1190_v33  }
  0xbc   :  { %v302_v49 = vpop.permute.xlu1 %301  ;;  %v297_v50 = vpop.permute.xlu0 %296 }
  0xbd   :  { %1423 = vperm.xlu1 %1748, %v1193_v36   ;;  %1418 = vperm.xlu0 %1747, %v1192_v37  }
  0xc0   :  { %v312_v51 = vpop.permute.xlu1 %311  ;;  %v307_v54 = vpop.permute.xlu0 %306 }
  0xc1   :  { %1433 = vperm.xlu1 %1748, %v1195_v40   ;;  %1428 = vperm.xlu0 %1747, %v1194_v41  }
  0xc4   :  { %v2484_v55 = vpop.permute.xlu1 %321  ;;  %v2486_v56 = vpop.permute.xlu0 %316 }
  0xc5   :  { %1540 = vperm.xlu0 %1747, %v1537_v42  }
  0xc8   :  { %v2488_v57 = vpop.permute.xlu1 %331  ;;  %v327_v60 = vpop.permute.xlu0 %326 }
  0xcc   :  { %v2490_v61 = vpop.permute.xlu1 %341  ;;  %v2492_v0 = vpop.permute.xlu0 %336 }
  0xd0   :  { %v2494_v1 = vpop.permute.xlu1 %351  ;;  %v2496_v2 = vpop.permute.xlu0 %346 }
  0xd4   :  { %v2498_v3 = vpop.permute.xlu1 %361  ;;  %v2500_v6 = vpop.permute.xlu0 %356 }
  0xd8   :  { %v2502_v7 = vpop.permute.xlu1 %371  ;;  %v2504_v10 = vpop.permute.xlu0 %366 }
  0xdc   :  { %v2529_v40 = vpop.permute.xlu1 %381  ;;  %v2531_v41 = vpop.permute.xlu0 %376 }
 0x101   :  { %v1695_v11 = vpop.f32.mrb[0].mxu0  ;;  %v1719_v12 = vpop.f32.mrb[0].mxu1 }
 0x102   :  { %v2507_v13 = vadd.f32 %v1695_v11, %v2340_v52  ;;  %v2509_v16 = vadd.f32 %v1719_v12, %v287_v48  ;;  %v621_v17 = vpop.f32.mrb[1].mxu0  ;;  %v717_v20 = vpop.f32.mrb[1].mxu1 }
 0x103   :  { %v2512_v21 = vadd.f32 %v621_v17, %v2342_v53  ;;  %v2514_v22 = vadd.f32 %v717_v20, %v277_v46  ;;  %v1696_v23 = vpop.f32.mrb[2].mxu0  ;;  %v1720_v26 = vpop.f32.mrb[2].mxu1 }
 0x104   :  { %v1617_v27 = vmul.f32 -1.442695, %v2507_v13  ;;  %v2518_v30 = vadd.f32 %v1696_v23, %v2356_v58  ;;  %v2520_v31 = vadd.f32 %v1720_v26, %v292_v47  ;;  %v624_v52 = vpop.f32.mrb[3].mxu0  ;;  %v720_v32 = vpop.f32.mrb[3].mxu1 }
 0x105   :  { %v1615_v33 = vmul.f32 -1.442695, %v2512_v21  ;;  %v2524_v36 = vadd.f32 %v624_v52, %v2358_v59  ;;  %v2526_v53 = vadd.f32 %v720_v32, %v282_v45 }
 0x106   :  { %1789 = vpow2.f32 %v1617_v27  ;;  %v1618_v37 = vmul.f32 -1.442695, %v2518_v30 }
 0x107   :  { %1791 = vpow2.f32 %v1615_v33  ;;  %v1616_v58 = vmul.f32 -1.442695, %v2524_v36  ;;  %v2557_v33 = vpop.permute.xlu0 %386 }
 0x108   :  { %1793 = vpow2.f32 %v1618_v37 }
 0x109   :  { %v1699_v42 = vpop.f32.mrb[4].mxu0  ;;  %v1723_v46 = vpop.f32.mrb[4].mxu1  ;;  %1795 = vpow2.f32 %v1616_v58 }
 0x10a   :  { %v2535_v47 = vadd.f32 %v1699_v42, %v2384_v5  ;;  %v2537_v59 = vadd.f32 %v1723_v46, %v307_v54  ;;  %v637_v45 = vpop.f32.mrb[5].mxu0  ;;  %v733_v48 = vpop.f32.mrb[5].mxu1 }
 0x10b   :  { %v2540_v11 = vadd.f32 %v637_v45, %v2368_v63  ;;  %v2542_v12 = vadd.f32 %v733_v48, %v297_v50  ;;  %v1700_v17 = vpop.f32.mrb[6].mxu0  ;;  %v1724_v20 = vpop.f32.mrb[6].mxu1 }
 0x10c   :  { %2823 = vst [vmem:[#allocation6_spill] sm:$0xff] %v2537_v59  ;;  %v2545_v23 = vadd.f32 %v1700_v17, %v2382_v4  ;;  %v2548_v27 = vadd.f32 %v1724_v20, %v312_v51  ;;  %v640_v5 = vpop.f32.mrb[7].mxu0  ;;  %v736_v54 = vpop.f32.mrb[7].mxu1 }
 0x10d   :  { %2824 = vst [vmem:[#allocation7_spill] sm:$0xff] %v2542_v12  ;;  %v1619_v26 = vmul.f32 -1.442695, %v2540_v11  ;;  %v2551_v52 = vadd.f32 %v640_v5, %v2366_v62  ;;  %v2553_v32 = vadd.f32 %v736_v54, %v302_v49  ;;  %v2555_v50 = vpop.permute.xlu1 %391 }
 0x10e   :  { %2825 = vst [vmem:[#allocation8_spill] sm:$0xff] %v2548_v27 }
 0x10f   :  { %2826 = vst [vmem:[#allocation9_spill] sm:$0xff] %v2553_v32  ;;  %1797 = vpow2.f32 %v1619_v26 }
 0x110   :  { %v1790_v63 = vpop.eup %1789 }
 0x111   :  { %v1703_v37 = vpop.f32.mrb[8].mxu0  ;;  %v1727_v4 = vpop.f32.mrb[8].mxu1  ;;  %v958_v62 = vadd.f32 1.0, %v1790_v63 }
 0x112   :  { %v1792_v58 = vpop.eup %1791  ;;  %v2560_v42 = vadd.f32 %v1703_v37, %v2410_v15  ;;  %v2562_v51 = vadd.f32 %v1727_v4, %v327_v60  ;;  %v653_v46 = vpop.f32.mrb[9].mxu0  ;;  %v1621_v60 = vmul.f32 -1.442695, %v2535_v47 }
 0x113   :  { %v749_v45 = vpop.f32.mrb[9].mxu1  ;;  %v956_v48 = vadd.f32 1.0, %v1792_v58  ;;  %v2565_v49 = vadd.f32 %v653_v46, %v2394_v9  ;;  %v1704_v20 = vpop.f32.mrb[10].mxu0 }
 0x114   :  { %2827 = vst [vmem:[#allocation10_spill] sm:$0xff] %v2562_v51  ;;  %v2568_v17 = vadd.f32 %v749_v45, %v2486_v56  ;;  %v1728_v26 = vpop.f32.mrb[10].mxu1  ;;  %v1794_v5 = vpop.eup %1793  ;;  %v2572_v37 = vadd.f32 %v1704_v20, %v2408_v14  ;;  %v1622_v45 = vmul.f32 -1.442695, %v2545_v23 }
 0x115   :  { %1799 = vrcp.f32 %v956_v48  ;;  %v959_v54 = vadd.f32 1.0, %v1794_v5  ;;  %v656_v27 = vpop.f32.mrb[11].mxu0  ;;  %v1796_v15 = vpop.eup %1795  ;;  %v2575_v63 = vadd.f32 %v1728_v26, %v2488_v57 }
 0x116   :  { %2828 = vst [vmem:[#allocation11_spill] sm:$0xff] %v2568_v17  ;;  %v752_v9 = vpop.f32.mrb[11].mxu1  ;;  %1801 = vrcp.f32 %v958_v62  ;;  %v957_v4 = vadd.f32 1.0, %v1796_v15  ;;  %v2578_v56 = vadd.f32 %v656_v27, %v2392_v8  ;;  %v1204_v46 = vpop.permute.xlu1 %1203 }
 0x117   :  { %2829 = vst [vmem:[#allocation12_spill] sm:$0xff] %v2575_v63  ;;  %v2581_v58 = vadd.f32 %v752_v9, %v2484_v55  ;;  %1803 = vrcp.f32 %v959_v54  ;;  %v1199_v48 = vpop.permute.xlu0 %1198 }
 0x118   :  { %1805 = vrcp.f32 %v957_v4 }
 0x119   :  { %2830 = vst [vmem:[#allocation13_spill] sm:$0xff] %v2581_v58  ;;  %v1707_v14 = vpop.f32.mrb[12].mxu0  ;;  %v1798_v20 = vpop.eup %1797  ;;  %1807 = vpow2.f32 %v1621_v60 }
 0x11a   :  { %v2585_v57 = vadd.f32 %v1707_v14, %v2436_v25  ;;  %v1731_v26 = vpop.f32.mrb[12].mxu1  ;;  %v669_v62 = vpop.f32.mrb[13].mxu0  ;;  %v960_v5 = vadd.f32 1.0, %v1798_v20  ;;  %1809 = vpow2.f32 %v1622_v45  ;;  %v1620_v25 = vmul.f32 -1.442695, %v2551_v52 }
 0x11b   :  { %v2588_v8 = vadd.f32 %v1731_v26, %v2496_v2  ;;  %v2591_v55 = vadd.f32 %v669_v62, %v2420_v19  ;;  %v765_v27 = vpop.f32.mrb[13].mxu1  ;;  %v1708_v54 = vpop.f32.mrb[14].mxu0  ;;  %v1625_v20 = vmul.f32 -1.442695, %v2560_v42 }
 0x11c   :  { %v2594_v15 = vadd.f32 %v765_v27, %v2492_v0  ;;  %v1732_v9 = vpop.f32.mrb[14].mxu1  ;;  %1811 = vrcp.f32 %v960_v5  ;;  %v672_v4 = vpop.f32.mrb[15].mxu0  ;;  %v2598_v60 = vadd.f32 %v1708_v54, %v2434_v24  ;;  %v1623_v5 = vmul.f32 -1.442695, %v2565_v49 }
 0x11d   :  { %2831 = vst [vmem:[#allocation14_spill] sm:$0xff] %v2588_v8  ;;  %v768_v14 = vpop.f32.mrb[15].mxu1  ;;  %v2602_v19 = vadd.f32 %v1732_v9, %v2494_v1  ;;  %v2605_v45 = vadd.f32 %v672_v4, %v2418_v18  ;;  %v1214_v0 = vpop.permute.xlu1 %1213  ;;  %1813 = vpow2.f32 %v1620_v25  ;;  %v1626_v1 = vmul.f32 -1.442695, %v2572_v37 }
 0x11e   :  { %2832 = vst [vmem:[#allocation15_spill] sm:$0xff] %v2594_v15  ;;  %v1209_v62 = vpop.permute.xlu0 %1208  ;;  %1815 = vpow2.f32 %v1625_v20  ;;  %v2611_v9 = vadd.f32 %v768_v14, %v2490_v61 }
 0x11f   :  { %v1800_v2 = vpop.eup %1799  ;;  %2833 = vst [vmem:[#allocation16_spill] sm:$0xff] %v2602_v19  ;;  %1817 = vpow2.f32 %v1623_v5 }
 0x120   :  { %v1802_v26 = vpop.eup %1801  ;;  %v1100_v24 = vmul.f32 %v1800_v2, %v2512_v21  ;;  %2834 = vst [vmem:[#allocation17_spill] sm:$0xff] %v2611_v9  ;;  %v1624_v2 = vmul.f32 -1.442695, %v2578_v56  ;;  %1819 = vpow2.f32 %v1626_v1 }
 0x121   :  { %v1711_v27 = vpop.f32.mrb[16].mxu0  ;;  %v1804_v8 = vpop.eup %1803  ;;  %v1102_v19 = vmul.f32 %v1802_v26, %v2507_v13 }
 0x122   :  { %v1735_v54 = vpop.f32.mrb[16].mxu1  ;;  %v685_v15 = vpop.f32.mrb[17].mxu0  ;;  %v2616_v51 = vadd.f32 %v1711_v27, %v2462_v35  ;;  %v1436_v32 = vmul.f32 %v1199_v48, %v1100_v24  ;;  %v1103_v61 = vmul.f32 %v1804_v8, %v2518_v30  ;;  %1821 = vpow2.f32 %v1624_v2 }
 0x123   :  { %v1806_v63 = vpop.eup %1805  ;;  %v781_v18 = vpop.f32.mrb[17].mxu1  ;;  %v2621_v13 = vadd.f32 %v1735_v54, %v2504_v10  ;;  %v2624_v35 = vadd.f32 %v685_v15, %v2446_v29 }
 0x124   :  { %v1712_v4 = vpop.f32.mrb[18].mxu0  ;;  %v1101_v25 = vmul.f32 %v1806_v63, %v2524_v36  ;;  %v1736_v58 = vpop.f32.mrb[18].mxu1  ;;  %v1438_v63 = vmul.f32 %v1209_v62, %v1102_v19  ;;  %v2630_v29 = vadd.f32 %v781_v18, %v2500_v6 }
 0x125   :  { %v1808_v21 = vpop.eup %1807  ;;  %v688_v20 = vpop.f32.mrb[19].mxu0  ;;  %v2636_v2 = vadd.f32 %v1736_v58, %v2502_v7 }
 0x126   :  { %v1810_v17 = vpop.eup %1809  ;;  %v1437_v14 = vmul.f32 %v1204_v46, %v1101_v25  ;;  %v784_v9 = vpop.f32.mrb[19].mxu1  ;;  %v962_v5 = vadd.f32 1.0, %v1808_v21  ;;  %v1439_v46 = vmul.f32 %v1214_v0, %v1103_v61 }
 0x127   :  { %v1812_v59 = vpop.eup %1811  ;;  %v1219_v36 = vpop.permute.xlu0 %1218  ;;  %v963_v48 = vadd.f32 1.0, %v1810_v17  ;;  %v2633_v17 = vadd.f32 %v1712_v4, %v2460_v34 }
 0x128   :  { %v1484_v26 = vadd.f32 %v1437_v14, %v1436_v32  ;;  %v1104_v27 = vmul.f32 %v1812_v59, %v2540_v11  ;;  %v2627_v12 = vpop.permute.xlu1 %1223  ;;  %v1814_v54 = vpop.eup %1813  ;;  %1823 = vrcp.f32 %v962_v5  ;;  %v2642_v5 = vadd.f32 %v784_v9, %v2498_v3 }
 0x129   :  { %v1715_v30 = vpop.f32.mrb[20].mxu0  ;;  %v1739_v1 = vpop.f32.mrb[20].mxu1  ;;  %v961_v62 = vadd.f32 1.0, %v1814_v54  ;;  %1825 = vrcp.f32 %v963_v48 }
 0x12a   :  { %v1485_v8 = vadd.f32 %v1484_v26, %v1438_v63  ;;  %v1440_v24 = vmul.f32 %v1219_v36, %v1104_v27  ;;  %v701_v10 = vpop.f32.mrb[21].mxu0  ;;  %v797_v15 = vpop.f32.mrb[21].mxu1  ;;  %v2639_v63 = vadd.f32 %v688_v20, %v2444_v28  ;;  %v2645_v4 = vadd.f32 %v1715_v30, %v2482_v44 }
 0x12b   :  { %v1716_v19 = vpop.f32.mrb[22].mxu0  ;;  %v1740_v59 = vpop.f32.mrb[22].mxu1  ;;  %1827 = vrcp.f32 %v961_v62  ;;  %v2648_v7 = vadd.f32 %v1739_v1, %v2557_v33  ;;  %v2652_v28 = vadd.f32 %v701_v10, %v2472_v39  ;;  %v2655_v3 = vadd.f32 %v797_v15, %v2531_v41 }
 0x12c   :  { %v1486_v32 = vadd.f32 %v1485_v8, %v1439_v46  ;;  %v1816_v11 = vpop.eup %1815  ;;  %v704_v0 = vpop.f32.mrb[23].mxu0  ;;  %v1629_v46 = vmul.f32 -1.442695, %v2585_v57  ;;  %v1627_v44 = vmul.f32 -1.442695, %v2591_v55  ;;  %v2659_v33 = vadd.f32 %v1716_v19, %v2480_v43 }
 0x12d   :  { %v1229_v25 = vpop.permute.xlu0 %1228  ;;  %v800_v6 = vpop.f32.mrb[23].mxu1  ;;  %v966_v14 = vadd.f32 1.0, %v1816_v11  ;;  %v2662_v8 = vadd.f32 %v1740_v59, %v2555_v50  ;;  %v1630_v39 = vmul.f32 -1.442695, %v2598_v60  ;;  %v2666_v1 = vadd.f32 %v704_v0, %v2470_v38 }
 0x12e   :  { %v1487_v21 = vadd.f32 %v1486_v32, %v1440_v24  ;;  %v1818_v18 = vpop.eup %1817  ;;  %v1234_v61 = vpop.permute.xlu1 %1233  ;;  %v2671_v54 = vadd.f32 %v800_v6, %v2529_v40  ;;  %v1628_v15 = vmul.f32 -1.442695, %v2605_v45  ;;  %v1633_v38 = vmul.f32 -1.442695, %v2616_v51 }
 0x12f   :  { %v964_v36 = vadd.f32 1.0, %v1818_v18  ;;  %v1820_v26 = vpop.eup %1819  ;;  %v1631_v40 = vmul.f32 -1.442695, %v2624_v35 }
 0x130   :  { %v967_v34 = vadd.f32 1.0, %v1820_v26  ;;  %v1822_v27 = vpop.eup %1821 }
 0x131   :  { %1829 = vrcp.f32 %v964_v36  ;;  %v1239_v58 = vpop.permute.xlu0 %1238  ;;  %v965_v48 = vadd.f32 1.0, %v1822_v27  ;;  %v1632_v27 = vmul.f32 -1.442695, %v2639_v63 }
 0x132   :  { %1831 = vrcp.f32 %v966_v14  ;;  %v1824_v9 = vpop.eup %1823  ;;  %v1244_v20 = vpop.permute.xlu1 %1243 }
 0x133   :  { %1833 = vrcp.f32 %v967_v34  ;;  %v1826_v30 = vpop.eup %1825  ;;  %v1106_v41 = vmul.f32 %v1824_v9, %v2535_v47 }
 0x134   :  { %1835 = vrcp.f32 %v965_v48  ;;  %v1107_v50 = vmul.f32 %v1826_v30, %v2545_v23 }
 0x135   :  { %v1828_v24 = vpop.eup %1827  ;;  %1837 = vpow2.f32 %v1629_v46  ;;  %v1249_v43 = vpop.permute.xlu0 %1248  ;;  %v1442_v59 = vmul.f32 %v1229_v25, %v1106_v41 }
 0x136   :  { %v1105_v10 = vmul.f32 %v1828_v24, %v2551_v52  ;;  %1839 = vpow2.f32 %v1627_v44  ;;  %v1254_v62 = vpop.permute.xlu1 %1253  ;;  %v1443_v6 = vmul.f32 %v1234_v61, %v1107_v50 }
 0x137   :  { %1841 = vpow2.f32 %v1630_v39 }
 0x138   :  { %v1441_v19 = vmul.f32 %v2627_v12, %v1105_v10  ;;  %1843 = vpow2.f32 %v1628_v15  ;;  %v1634_v12 = vmul.f32 -1.442695, %v2633_v17 }
 0x139   :  { %v1259_v36 = vpop.permute.xlu0 %1258  ;;  %1845 = vpow2.f32 %v1633_v38 }
 0x13a   :  { %v1488_v47 = vadd.f32 %v1487_v21, %v1441_v19  ;;  %1847 = vpow2.f32 %v1631_v40 }
 0x13b   :  { %v1830_v32 = vpop.eup %1829  ;;  %1849 = vpow2.f32 %v1634_v12 }
 0x13c   :  { %v1108_v52 = vmul.f32 %v1830_v32, %v2565_v49  ;;  %v1832_v11 = vpop.eup %1831  ;;  %v1489_v18 = vadd.f32 %v1488_v47, %v1442_v59  ;;  %v2682_v49 = vpop.permute.xlu1 %1263  ;;  %1851 = vpow2.f32 %v1632_v27 }
 0x13d   :  { %v1834_v0 = vpop.eup %1833  ;;  %v1110_v26 = vmul.f32 %v1832_v11, %v2560_v42  ;;  %v1269_v39 = vpop.permute.xlu0 %1268 }
 0x13e   :  { %v1444_v14 = vmul.f32 %v1239_v58, %v1108_v52  ;;  %v1836_v23 = vpop.eup %1835  ;;  %v1490_v34 = vadd.f32 %v1489_v18, %v1443_v6  ;;  %v1111_v61 = vmul.f32 %v1834_v0, %v2572_v37  ;;  %v1637_v18 = vmul.f32 -1.442695, %v2645_v4 }
 0x13f   :  { %v1109_v25 = vmul.f32 %v1836_v23, %v2578_v56  ;;  %v1838_v21 = vpop.eup %1837  ;;  %v1446_v9 = vmul.f32 %v1249_v43, %v1110_v26  ;;  %v1639_v43 = vmul.f32 -1.442695, %v2514_v22  ;;  %v1635_v26 = vmul.f32 -1.442695, %v2652_v28 }
 0x140   :  { %v1491_v48 = vadd.f32 %v1490_v34, %v1444_v14  ;;  %v1840_v46 = vpop.eup %1839  ;;  %v970_v30 = vadd.f32 1.0, %v1838_v21  ;;  %v1447_v56 = vmul.f32 %v1254_v62, %v1111_v61  ;;  %v1274_v50 = vpop.permute.xlu1 %1273  ;;  %v1638_v61 = vmul.f32 -1.442695, %v2659_v33 }
 0x141   :  { %v1445_v58 = vmul.f32 %v1244_v20, %v1109_v25  ;;  %v968_v24 = vadd.f32 1.0, %v1840_v46  ;;  %v1842_v42 = vpop.eup %1841  ;;  %v1279_v38 = vpop.permute.xlu0 %1278  ;;  %v1640_v25 = vmul.f32 -1.442695, %v2526_v53 }
 0x142   :  { %v971_v10 = vadd.f32 1.0, %v1842_v42  ;;  %v1844_v15 = vpop.eup %1843 }
 0x143   :  { %v1492_v44 = vadd.f32 %v1491_v48, %v1445_v58  ;;  %1853 = vrcp.f32 %v968_v24  ;;  %v969_v32 = vadd.f32 1.0, %v1844_v15  ;;  %v1846_v37 = vpop.eup %1845  ;;  %v1641_v58 = vmul.f32 -1.442695, %v2509_v16 }
 0x144   :  { %1855 = vrcp.f32 %v970_v30  ;;  %v1848_v20 = vpop.eup %1847  ;;  %v974_v59 = vadd.f32 1.0, %v1846_v37  ;;  %v2687_v11 = vpop.permute.xlu1 %1283 }
 0x145   :  { %v1493_v41 = vadd.f32 %v1492_v44, %v1446_v9  ;;  %1857 = vrcp.f32 %v971_v10  ;;  %v972_v47 = vadd.f32 1.0, %v1848_v20  ;;  %v1850_v52 = vpop.eup %1849  ;;  %v1289_v14 = vpop.permute.xlu0 %1288  ;;  %v1636_v44 = vmul.f32 -1.442695, %v2666_v1 }
 0x146   :  { %1859 = vrcp.f32 %v969_v32  ;;  %v975_v62 = vadd.f32 1.0, %v1850_v52  ;;  %v1852_v40 = vpop.eup %1851  ;;  %v2835_v32 = vld [vmem:[#allocation7_spill] sm:$0xff] }
 0x147   :  { %v1494_v19 = vadd.f32 %v1493_v41, %v1447_v56  ;;  %1861 = vrcp.f32 %v972_v47  ;;  %v973_v6 = vadd.f32 1.0, %v1852_v40  ;;  %v1642_v56 = vmul.f32 -1.442695, %v2520_v31 }
 0x148   :  { %1863 = vpow2.f32 %v1639_v43  ;;  %v1294_v21 = vpop.permute.xlu1 %1293  ;;  %v1643_v37 = vmul.f32 -1.442695, %v2835_v32 }
 0x149   :  { %1865 = vrcp.f32 %v974_v59  ;;  %v2698_v30 = vpop.permute.xlu0 %1298 }
 0x14a   :  { %1867 = vrcp.f32 %v975_v62 }
 0x14b   :  { %1869 = vrcp.f32 %v973_v6 }
 0x14c   :  { %1871 = vpow2.f32 %v1637_v18  ;;  %v2837_v18 = vld [vmem:[#allocation9_spill] sm:$0xff] }
 0x14d   :  { %v1854_v0 = vpop.eup %1853  ;;  %1873 = vpow2.f32 %v1635_v26  ;;  %v2708_v40 = vpop.permute.xlu0 %1308 }
 0x14e   :  { %v1112_v23 = vmul.f32 %v1854_v0, %v2591_v55  ;;  %v1856_v12 = vpop.eup %1855  ;;  %1875 = vpow2.f32 %v1640_v25  ;;  %v2838_v25 = vld [vmem:[#allocation8_spill] sm:$0xff] }
 0x14f   :  { %v1858_v34 = vpop.eup %1857  ;;  %v1114_v46 = vmul.f32 %v1856_v12, %v2585_v57  ;;  %1877 = vpow2.f32 %v1638_v61  ;;  %v2703_v57 = vpop.permute.xlu1 %1303 }
 0x150   :  { %v1448_v27 = vmul.f32 %v1259_v36, %v1112_v23  ;;  %v1860_v48 = vpop.eup %1859  ;;  %v1115_v24 = vmul.f32 %v1858_v34, %v2598_v60  ;;  %1879 = vpow2.f32 %v1641_v58  ;;  %v2836_v60 = vld [vmem:[#allocation6_spill] sm:$0xff]  ;;  %v1644_v23 = vmul.f32 -1.442695, %v2837_v18 }
 0x151   :  { %v1113_v55 = vmul.f32 %v1860_v48, %v2605_v45  ;;  %v1862_v42 = vpop.eup %1861  ;;  %v1450_v10 = vmul.f32 %v1269_v39, %v1114_v46  ;;  %1881 = vpow2.f32 %v1636_v44  ;;  %v1645_v43 = vmul.f32 -1.442695, %v2836_v60 }
 0x152   :  { %v1495_v9 = vadd.f32 %v1494_v19, %v1448_v27  ;;  %v1864_v41 = vpop.eup %1863  ;;  %v1116_v15 = vmul.f32 %v1862_v42, %v2624_v35  ;;  %1883 = vpow2.f32 %v1642_v56  ;;  %v1646_v27 = vmul.f32 -1.442695, %v2838_v25 }
 0x153   :  { %v1449_v36 = vmul.f32 %v2682_v49, %v1113_v55  ;;  %v1866_v19 = vpop.eup %1865  ;;  %v1451_v49 = vmul.f32 %v1274_v50, %v1115_v24  ;;  %v980_v62 = vadd.f32 1.0, %v1864_v41  ;;  %1885 = vpow2.f32 %v1643_v37  ;;  %v2713_v12 = vpop.permute.xlu1 %1313 }
 0x154   :  { %v1868_v20 = vpop.eup %1867  ;;  %v1452_v47 = vmul.f32 %v1279_v38, %v1116_v15  ;;  %v1118_v39 = vmul.f32 %v1866_v19, %v2616_v51  ;;  %1887 = vpow2.f32 %v1645_v43  ;;  %v2718_v55 = vpop.permute.xlu0 %1318  ;;  %v2840_v15 = vld [vmem:[#allocation13_spill] sm:$0xff] }
 0x155   :  { %v1496_v45 = vadd.f32 %v1495_v9, %v1449_v36  ;;  %v1870_v52 = vpop.eup %1869  ;;  %v1119_v38 = vmul.f32 %v1868_v20, %v2633_v17  ;;  %1889 = vrcp.f32 %v980_v62  ;;  %v1648_v19 = vmul.f32 -1.442695, %v2840_v15  ;;  %v2841_v20 = vld [vmem:[#allocation10_spill] sm:$0xff]  ;;  %v2842_v62 = vld [vmem:[#allocation12_spill] sm:$0xff] }
 0x156   :  { %v1117_v35 = vmul.f32 %v1870_v52, %v2639_v63  ;;  %v1872_v6 = vpop.eup %1871  ;;  %v1454_v48 = vmul.f32 %v1289_v14, %v1118_v39  ;;  %1891 = vpow2.f32 %v1644_v23  ;;  %v1649_v43 = vmul.f32 -1.442695, %v2841_v20  ;;  %v2843_v23 = vld [vmem:[#allocation15_spill] sm:$0xff] }
 0x157   :  { %v1497_v59 = vadd.f32 %v1496_v45, %v1450_v10  ;;  %v1874_v34 = vpop.eup %1873  ;;  %v978_v63 = vadd.f32 1.0, %v1872_v6  ;;  %v1455_v44 = vmul.f32 %v1294_v21, %v1119_v38  ;;  %v2721_v41 = vpop.permute.xlu1 %1323  ;;  %v1650_v39 = vmul.f32 -1.442695, %v2842_v62 }
 0x158   :  { %v1453_v26 = vmul.f32 %v2687_v11, %v1117_v35  ;;  %v1876_v51 = vpop.eup %1875  ;;  %v976_v58 = vadd.f32 1.0, %v1874_v34  ;;  %v2839_v11 = vld [vmem:[#allocation11_spill] sm:$0xff]  ;;  %v2844_v34 = vld [vmem:[#allocation17_spill] sm:$0xff] }
 0x159   :  { %v1498_v0 = vadd.f32 %v1497_v59, %v1451_v49  ;;  %v1878_v46 = vpop.eup %1877  ;;  %v1647_v42 = vmul.f32 -1.442695, %v2839_v11  ;;  %v981_v56 = vadd.f32 1.0, %v1876_v51 }
 0x15a   :  { %v1880_v9 = vpop.eup %1879  ;;  %1893 = vrcp.f32 %v976_v58  ;;  %v979_v17 = vadd.f32 1.0, %v1878_v46  ;;  %v2845_v46 = vld [vmem:[#allocation14_spill] sm:$0xff] }
 0x15b   :  { %v1499_v50 = vadd.f32 %v1498_v0, %v1452_v47  ;;  %v1882_v36 = vpop.eup %1881  ;;  %1895 = vpow2.f32 %v1646_v27  ;;  %v982_v37 = vadd.f32 1.0, %v1880_v9  ;;  %v2725_v47 = vpop.permute.xlu0 %1328  ;;  %v1652_v27 = vmul.f32 -1.442695, %v2844_v34 }
 0x15c   :  { %1897 = vrcp.f32 %v978_v63  ;;  %v977_v10 = vadd.f32 1.0, %v1882_v36  ;;  %v1884_v45 = vpop.eup %1883  ;;  %v2728_v35 = vpop.permute.xlu1 %1333  ;;  %v1653_v9 = vmul.f32 -1.442695, %v2845_v46  ;;  %v2846_v36 = vld [vmem:[#allocation16_spill] sm:$0xff] }
 0x15d   :  { %v1500_v61 = vadd.f32 %v1499_v50, %v1453_v26  ;;  %1899 = vrcp.f32 %v979_v17  ;;  %v1886_v21 = vpop.eup %1885  ;;  %v983_v59 = vadd.f32 1.0, %v1884_v45  ;;  %v1651_v50 = vmul.f32 -1.442695, %v2843_v23 }
 0x15e   :  { %1901 = vrcp.f32 %v977_v10  ;;  %v1888_v49 = vpop.eup %1887  ;;  %v984_v0 = vadd.f32 1.0, %v1886_v21 }
 0x15f   :  { %v1501_v24 = vadd.f32 %v1500_v61, %v1454_v48  ;;  %1903 = vpow2.f32 %v1647_v42  ;;  %v1890_v52 = vpop.eup %1889  ;;  %v2733_v63 = vpop.permute.xlu0 %1338  ;;  %v986_v17 = vadd.f32 1.0, %v1888_v49  ;;  %v1654_v42 = vmul.f32 -1.442695, %v2846_v36 }
 0x160   :  { %1905 = vrcp.f32 %v981_v56  ;;  %v1892_v6 = vpop.eup %1891  ;;  %v2738_v56 = vpop.permute.xlu1 %1343 }
 0x161   :  { %v1502_v14 = vadd.f32 %v1501_v24, %v1455_v44  ;;  %1907 = vpow2.f32 %v1648_v19  ;;  %v985_v61 = vadd.f32 1.0, %v1892_v6  ;;  %v1124_v6 = vmul.f32 %v1890_v52, %v2514_v22 }
 0x162   :  { %1909 = vrcp.f32 %v982_v37 }
 0x163   :  { %1911 = vpow2.f32 %v1649_v43 }
 0x164   :  { %v1894_v38 = vpop.eup %1893  ;;  %1913 = vrcp.f32 %v983_v59 }
 0x165   :  { %v1896_v26 = vpop.eup %1895  ;;  %1915 = vpow2.f32 %v1650_v39  ;;  %v1120_v51 = vmul.f32 %v1894_v38, %v2652_v28 }
 0x166   :  { %v1898_v48 = vpop.eup %1897  ;;  %1917 = vrcp.f32 %v984_v0  ;;  %v987_v21 = vadd.f32 1.0, %v1896_v26 }
 0x167   :  { %v1900_v58 = vpop.eup %1899  ;;  %1919 = vpow2.f32 %v1651_v50  ;;  %v1456_v44 = vmul.f32 %v2698_v30, %v1120_v51  ;;  %v1122_v28 = vmul.f32 %v1898_v48, %v2645_v4  ;;  %v1655_v30 = vmul.f32 -1.442695, %v2630_v29  ;;  %v2746_v4 = vpop.permute.xlu0 %1348 }
 0x168   :  { %v1902_v24 = vpop.eup %1901  ;;  %1921 = vpow2.f32 %v1652_v27  ;;  %v1123_v49 = vmul.f32 %v1900_v58, %v2659_v33  ;;  %v1657_v48 = vmul.f32 -1.442695, %v2621_v13 }
 0x169   :  { %v1904_v10 = vpop.eup %1903  ;;  %v1503_v45 = vadd.f32 %v1502_v14, %v1456_v44  ;;  %v1121_v19 = vmul.f32 %v1902_v24, %v2666_v1  ;;  %1923 = vrcp.f32 %v985_v61  ;;  %v1656_v1 = vmul.f32 -1.442695, %v2642_v5 }
 0x16a   :  { %v1906_v37 = vpop.eup %1905  ;;  %1925 = vpow2.f32 %v1653_v9  ;;  %v988_v0 = vadd.f32 1.0, %v1904_v10  ;;  %v1458_v50 = vmul.f32 %v2708_v40, %v1122_v28  ;;  %v1459_v22 = vmul.f32 %v2713_v12, %v1123_v49 }
 0x16b   :  { %v1908_v43 = vpop.eup %1907  ;;  %v1457_v59 = vmul.f32 %v2703_v57, %v1121_v19  ;;  %1927 = vrcp.f32 %v986_v17  ;;  %v1125_v33 = vmul.f32 %v1906_v37, %v2526_v53  ;;  %v2751_v57 = vpop.permute.xlu1 %1353  ;;  %v1460_v44 = vmul.f32 %v2718_v55, %v1124_v6 }
 0x16c   :  { %v1910_v39 = vpop.eup %1909  ;;  %1929 = vpow2.f32 %v1654_v42  ;;  %v989_v27 = vadd.f32 1.0, %v1908_v43  ;;  %v1658_v24 = vmul.f32 -1.442695, %v2636_v2  ;;  %v2759_v10 = vpop.permute.xlu0 %1358  ;;  %v1660_v49 = vmul.f32 -1.442695, %v2671_v54 }
 0x16d   :  { %v1912_v14 = vpop.eup %1911  ;;  %v1504_v38 = vadd.f32 %v1503_v45, %v1457_v59  ;;  %1931 = vrcp.f32 %v987_v21  ;;  %v1126_v40 = vmul.f32 %v1910_v39, %v2509_v16  ;;  %v1461_v28 = vmul.f32 %v2721_v41, %v1125_v33 }
 0x16e   :  { %v1914_v26 = vpop.eup %1913  ;;  %1933 = vpow2.f32 %v1655_v30  ;;  %v990_v58 = vadd.f32 1.0, %v1912_v14  ;;  %v1659_v45 = vmul.f32 -1.442695, %v2655_v3  ;;  %v1661_v14 = vmul.f32 -1.442695, %v2648_v7 }
 0x16f   :  { %v1916_v51 = vpop.eup %1915  ;;  %v1505_v52 = vadd.f32 %v1504_v38, %v1458_v50  ;;  %1935 = vrcp.f32 %v988_v0  ;;  %v1127_v42 = vmul.f32 %v1914_v26, %v2520_v31  ;;  %v1364_v21 = vpop.permute.xlu1 %1363  ;;  %v1462_v30 = vmul.f32 %v2725_v47, %v1126_v40 }
 0x170   :  { %v1918_v61 = vpop.eup %1917  ;;  %1937 = vpow2.f32 %v1656_v1  ;;  %v991_v17 = vadd.f32 1.0, %v1916_v51  ;;  %v1369_v38 = vpop.permute.xlu0 %1368  ;;  %v1662_v33 = vmul.f32 -1.442695, %v2662_v8 }
 0x171   :  { %v1920_v9 = vpop.eup %1919  ;;  %v1506_v53 = vadd.f32 %v1505_v52, %v1459_v22  ;;  %1939 = vrcp.f32 %v989_v27  ;;  %v1128_v37 = vmul.f32 %v1918_v61, %v2835_v32  ;;  %v1463_v41 = vmul.f32 %v2728_v35, %v1127_v42 }
 0x172   :  { %v1922_v12 = vpop.eup %1921  ;;  %1941 = vpow2.f32 %v1657_v48  ;;  %v992_v55 = vadd.f32 1.0, %v1920_v9 }
 0x173   :  { %v1507_v16 = vadd.f32 %v1506_v53, %v1460_v44  ;;  %v1924_v19 = vpop.eup %1923  ;;  %1943 = vrcp.f32 %v990_v58  ;;  %v993_v39 = vadd.f32 1.0, %v1922_v12  ;;  %v1464_v47 = vmul.f32 %v2733_v63, %v1128_v37 }
 0x174   :  { %v1926_v43 = vpop.eup %1925  ;;  %1945 = vpow2.f32 %v1658_v24  ;;  %v1129_v6 = vmul.f32 %v1924_v19, %v2837_v18  ;;  %v1374_v18 = vpop.permute.xlu1 %1373 }
 0x175   :  { %v1508_v31 = vadd.f32 %v1507_v16, %v1461_v28  ;;  %v1928_v59 = vpop.eup %1927  ;;  %1947 = vrcp.f32 %v991_v17  ;;  %v994_v50 = vadd.f32 1.0, %v1926_v43  ;;  %v1379_v42 = vpop.permute.xlu0 %1378 }
 0x176   :  { %v1930_v0 = vpop.eup %1929  ;;  %1949 = vpow2.f32 %v1659_v45  ;;  %v1130_v27 = vmul.f32 %v1928_v59, %v2836_v60  ;;  %v1465_v52 = vmul.f32 %v2738_v56, %v1129_v6 }
 0x177   :  { %v1509_v32 = vadd.f32 %v1508_v31, %v1462_v30  ;;  %v1932_v1 = vpop.eup %1931  ;;  %1951 = vrcp.f32 %v992_v55  ;;  %v995_v48 = vadd.f32 1.0, %v1930_v0 }
 0x178   :  { %v1934_v26 = vpop.eup %1933  ;;  %1953 = vpow2.f32 %v1660_v49  ;;  %v1131_v61 = vmul.f32 %v1932_v1, %v2838_v25  ;;  %v1466_v60 = vmul.f32 %v2746_v4, %v1130_v27  ;;  %v1384_v19 = vpop.permute.xlu1 %1383 }
 0x179   :  { %v1510_v35 = vadd.f32 %v1509_v32, %v1463_v41  ;;  %v1936_v51 = vpop.eup %1935  ;;  %1955 = vrcp.f32 %v993_v39  ;;  %v996_v40 = vadd.f32 1.0, %v1934_v26  ;;  %v1389_v39 = vpop.permute.xlu0 %1388 }
 0x17a   :  { %v1938_v22 = vpop.eup %1937  ;;  %1957 = vpow2.f32 %v1661_v14  ;;  %v1132_v44 = vmul.f32 %v1936_v51, %v2839_v11  ;;  %v1467_v56 = vmul.f32 %v2751_v57, %v1131_v61 }
 0x17b   :  { %v1511_v58 = vadd.f32 %v1510_v35, %v1464_v47  ;;  %v1940_v63 = vpop.eup %1939  ;;  %1959 = vrcp.f32 %v994_v50  ;;  %v997_v17 = vadd.f32 1.0, %v1938_v22 }
 0x17c   :  { %v1942_v9 = vpop.eup %1941  ;;  %1961 = vpow2.f32 %v1662_v33  ;;  %v1133_v25 = vmul.f32 %v1940_v63, %v2840_v15  ;;  %v1468_v4 = vmul.f32 %v2759_v10, %v1132_v44  ;;  %v1394_v1 = vpop.permute.xlu1 %1393 }
 0x17d   :  { %v1512_v24 = vadd.f32 %v1511_v58, %v1465_v52  ;;  %v1944_v53 = vpop.eup %1943  ;;  %1963 = vrcp.f32 %v995_v48  ;;  %v998_v16 = vadd.f32 1.0, %v1942_v9 }
 0x17e   :  { %v1946_v12 = vpop.eup %1945  ;;  %1965 = vrcp.f32 %v996_v40  ;;  %v1134_v11 = vmul.f32 %v1944_v53, %v2841_v20  ;;  %v1469_v49 = vmul.f32 %v1364_v21, %v1133_v25 }
 0x17f   :  { %v1513_v28 = vadd.f32 %v1512_v24, %v1466_v60  ;;  %v1948_v45 = vpop.eup %1947  ;;  %v999_v30 = vadd.f32 1.0, %v1946_v12  ;;  %1967 = vrcp.f32 %v997_v17 }
 0x180   :  { %v1950_v55 = vpop.eup %1949  ;;  %v1135_v57 = vmul.f32 %v1948_v45, %v2842_v62  ;;  %1969 = vrcp.f32 %v998_v16  ;;  %v1470_v6 = vmul.f32 %v1369_v38, %v1134_v11 }
 0x181   :  { %v1514_v37 = vadd.f32 %v1513_v28, %v1467_v56  ;;  %v1952_v43 = vpop.eup %1951  ;;  %v1000_v41 = vadd.f32 1.0, %v1950_v55  ;;  %1971 = vrcp.f32 %v999_v30 }
 0x182   :  { %v1954_v31 = vpop.eup %1953  ;;  %v1136_v14 = vmul.f32 %v1952_v43, %v2843_v23  ;;  %v1471_v47 = vmul.f32 %v1374_v18, %v1135_v57  ;;  %v1399_v23 = vpop.permute.xlu0 %1398 }
 0x183   :  { %v1515_v59 = vadd.f32 %v1514_v37, %v1468_v4  ;;  %v1956_v15 = vpop.eup %1955  ;;  %v1001_v20 = vadd.f32 1.0, %v1954_v31  ;;  %1973 = vrcp.f32 %v1000_v41  ;;  %v1404_v18 = vpop.permute.xlu1 %1403 }
 0x184   :  { %v1958_v0 = vpop.eup %1957  ;;  %v1137_v21 = vmul.f32 %v1956_v15, %v2844_v34  ;;  %v1472_v33 = vmul.f32 %v1379_v42, %v1136_v14 }
 0x185   :  { %v1516_v10 = vadd.f32 %v1515_v59, %v1469_v49  ;;  %v1960_v32 = vpop.eup %1959  ;;  %v1002_v27 = vadd.f32 1.0, %v1958_v0  ;;  %1975 = vrcp.f32 %v1001_v20 }
 0x186   :  { %v1962_v50 = vpop.eup %1961  ;;  %v1138_v51 = vmul.f32 %v1960_v32, %v2845_v46  ;;  %v1473_v22 = vmul.f32 %v1384_v19, %v1137_v21  ;;  %v1409_v53 = vpop.permute.xlu0 %1408  ;;  %v1543_v32 = vlaneseq }
 0x187   :  { %v1517_v26 = vadd.f32 %v1516_v10, %v1470_v6  ;;  %v1964_v62 = vpop.eup %1963  ;;  %v1003_v48 = vadd.f32 1.0, %v1962_v50  ;;  %1977 = vrcp.f32 %v1002_v27  ;;  %v1414_v56 = vpop.permute.xlu1 %1413 }
 0x188   :  { %v1966_v38 = vpop.eup %1965  ;;  %v1139_v61 = vmul.f32 %v1964_v62, %v2846_v36  ;;  %v1474_v34 = vmul.f32 %v1389_v39, %v1138_v51 }
 0x189   :  { %v1518_v35 = vadd.f32 %v1517_v26, %v1471_v47  ;;  %v1968_v58 = vpop.eup %1967  ;;  %v1140_v40 = vmul.f32 %v1966_v38, %v2630_v29  ;;  %1979 = vrcp.f32 %v1003_v48 }
 0x18a   :  { %v1970_v9 = vpop.eup %1969  ;;  %v1475_v60 = vmul.f32 %v1394_v1, %v1139_v61  ;;  %v1141_v46 = vmul.f32 %v1968_v58, %v2642_v5  ;;  %v1419_v11 = vpop.permute.xlu0 %1418  ;;  %v1544_v1 = vshrl.u32 %v1543_v32, 7 }
 0x18b   :  { %v1519_v52 = vadd.f32 %v1518_v35, %v1472_v33  ;;  %v1972_v24 = vpop.eup %1971  ;;  %v1476_v17 = vmul.f32 %v1399_v23, %v1140_v40  ;;  %v1142_v12 = vmul.f32 %v1970_v9, %v2621_v13  ;;  %v1424_v31 = vpop.permute.xlu1 %1423 }
 0x18c   :  { %v1477_v25 = vmul.f32 %v1404_v18, %v1141_v46  ;;  %v1143_v45 = vmul.f32 %v1972_v24, %v2636_v2  ;;  %v1545_v47 = vsub.s32 0, %v1544_v1 }
 0x18d   :  { %v1520_v63 = vadd.f32 %v1519_v52, %v1473_v22  ;;  %v1974_v36 = vpop.eup %1973  ;;  %v1478_v29 = vmul.f32 %v1409_v53, %v1142_v12 }
 0x18e   :  { %v1144_v55 = vmul.f32 %v1974_v36, %v2655_v3  ;;  %v1479_v5 = vmul.f32 %v1414_v56, %v1143_v45  ;;  %v1429_v41 = vpop.permute.xlu0 %1428 }
 0x18f   :  { %v1521_v44 = vadd.f32 %v1520_v63, %v1474_v34  ;;  %v1976_v16 = vpop.eup %1975  ;;  %v1434_v3 = vpop.permute.xlu1 %1433 }
 0x190   :  { %v1145_v43 = vmul.f32 %v1976_v16, %v2671_v54  ;;  %v1480_v13 = vmul.f32 %v1419_v11, %v1144_v55 }
 0x191   :  { %v1522_v42 = vadd.f32 %v1521_v44, %v1475_v60  ;;  %v1978_v4 = vpop.eup %1977 }
 0x192   :  { %v1146_v57 = vmul.f32 %v1978_v4, %v2648_v7  ;;  %v1481_v59 = vmul.f32 %v1424_v31, %v1145_v43  ;;  %v1541_v26 = vpop.permute.xlu0 %1540 }
 0x193   :  { %v1523_v28 = vadd.f32 %v1522_v42, %v1476_v17  ;;  %v1980_v30 = vpop.eup %1979  ;;  %v1546_v62 = vrot.slane %v1541_v26, %v1545_v47 }
 0x194   :  { %v1147_v2 = vmul.f32 %v1980_v30, %v2662_v8  ;;  %v1482_v39 = vmul.f32 %v1429_v41, %v1146_v57 }
 0x195   :  { %v1524_v19 = vadd.f32 %v1523_v28, %v1477_v25 }
 0x196   :  { %v1483_v6 = vmul.f32 %v1434_v3, %v1147_v2 }
 0x197   :  { %v1525_v37 = vadd.f32 %v1524_v19, %v1478_v29 }
 0x199   :  { %v1526_v49 = vadd.f32 %v1525_v37, %v1479_v5 }
 0x19b   :  { %v1527_v15 = vadd.f32 %v1526_v49, %v1480_v13 }
 0x19d   :  { %v1528_v0 = vadd.f32 %v1527_v15, %v1481_v59 }
 0x19f   :  { %v1529_v14 = vadd.f32 %v1528_v0, %v1482_v39 }
 0x1a1   :  { %v1530_v10 = vadd.f32 %v1529_v14, %v1483_v6 }
 0x1a3   :  { %v1531_v20 = vrot.slane %v1530_v10, 4 }
 0x1a5   :  { %v1532_v54 = vadd.f32 %v1531_v20, %v1530_v10 }
 0x1a7   :  { %v1533_v50 = vrot.slane %v1532_v54, 2 }
 0x1a9   :  { %v1534_v21 = vadd.f32 %v1533_v50, %v1532_v54 }
 0x1ab   :  { %v1535_v7 = vrot.slane %v1534_v21, 1 }
 0x1ad   :  { %v1536_v8 = vadd.f32 %v1535_v7, %v1534_v21 }
 0x1af   :  { %v1547_v27 = vadd.f32 %v1546_v62, %v1536_v8 }
 0x1b1   :  { %1548 = vst [vmem:[#allocation3] sm:$0x1] %v1547_v27 }
 0x1b2   :  { %1992 = shalt.err (!%p1989_p4)
}
 0x1b3   :  { %s1993_s22 = scalar_lea.hbm %s2810_s5, 16 }
 0x1b4   :  { %p1994_p5 = scmp.ne.s32.totalorder %s2810_s5, %s1993_s22  ;;  %p1997_p6 = scmp.lt.u32.totalorder %s1993_s22, %s2810_s5 }
 0x1b6   :  { %p1999_p7 = pnand %p1997_p6, %p1994_p5 }
 0x1b8   :  { %2002 = shalt.err (!%p1999_p7)
}
 0x1b9   :  { %1558 = dma.vmem_to_hbm [thread:$0]  %s1556_s18, 16, %s2810_s5, [#allocation4]  }
 0x1ba   :  { %2003 = dma.done.wait [#allocation4], 16  }
 0x1bb   :  { %2004 = vsyncadd [#allocation4], 4294967280 }
 0x1bc   :  { %1562 = vsyncpa [#allocation4], 1 }

</bundles_post_ra>
